<compile_context>
chip_gen: v6e
topology: v6e:2x2x1
jax: 0.10.0
libtpu: 0.0.40
codegen_flags: <defaults>
</compile_context>

<pallas_src>
import functools

import jax
import jax.numpy as jnp
from jax.experimental import pallas as pl
from jax.experimental.pallas import tpu as pltpu

NEG_SLOPE = 0.01   # nn.LeakyReLU default
BN_EPS = 1e-5      # nn.BatchNorm1d default
LANE = 128         # padded width of every internal feature dim / output lanes


# ----------------------------- Pallas kernel ------------------------------- #

def comp_class_kernel(embed_dim, x_ref, w_ref, b_ref, out_ref):
    """Fused CompClassModel forward (eval mode, BN pre-folded), one batch tile.

    x_ref   : (tm, dim)          bf16 input tile
    w_ref   : (dim + 4*128, 128) bf16 packed weight slab (VMEM-resident)
              rows [0:dim]            -> BN0+Linear0+BN folded   (dim -> 128)
              rows [dim:dim+128]      -> Linear1+BN folded       (128 -> 128)
              rows [dim+128:dim+256]  -> MLP-out @ activate_out  (128 -> 128)
              rows [dim+256:dim+384]  -> classifier hidden + BN  (128 -> 128)
              rows [dim+384:dim+512]  -> classifier output, cols at lanes
                                         [E,E+2) and duplicated at [E+2,E+4)
    b_ref   : (8, 128)           f32 packed biases (rows 0..4 used)
    out_ref : (tm, 128)          f32 packed output [embeds | logits | log_probs]
    """
    dim = x_ref.shape[1]
    b = b_ref[...]                               # (8, 128), single full load

    def mm(a_bf16, r0, r1):
        # bf16 feeds, f32 MXU accumulation.
        return jnp.dot(a_bf16, w_ref[r0:r1, :],
                       preferred_element_type=jnp.float32)

    def leaky_bf16(h):
        # LeakyReLU (single VALU max) + one re-quantization per layer
        # (halves vreg/VMEM pressure between layers).
        return jnp.maximum(h, NEG_SLOPE * h).astype(jnp.bfloat16)

    x = x_ref[...]                                           # (tm, dim) bf16

    # [BN0 -> Linear(dim,H) -> BN] folded into one matmul, then LeakyReLU.
    h = leaky_bf16(mm(x, 0, dim) + b[0:1, :])
    # [Linear(H,H) -> BN] folded, then LeakyReLU.
    h = leaky_bf16(mm(h, dim, dim + LANE) + b[1:2, :])
    # MLP output Linear(H,H) and activate_out Linear(H,E) pre-multiplied host-side.
    # Lanes >= embed_dim are exactly 0 (zero-padded weight cols + zero bias lanes).
    emb = mm(h, dim + LANE, dim + 2 * LANE) + b[2:3, :]      # (tm, 128) f32
    # classifier hidden [Linear(E,C) -> BN] folded, then LeakyReLU.
    c = leaky_bf16(mm(emb.astype(jnp.bfloat16),
                      dim + 2 * LANE, dim + 3 * LANE) + b[3:4, :])
    # classifier output Linear(C,2): real logits at lanes [E, E+2) and a copy
    # at [E+2, E+4); all other lanes exactly 0.
    dual = mm(c, dim + 3 * LANE, dim + 4 * LANE) + b[4:5, :]

    # LogSoftmax over the 2 real classes, written in place at lanes [E+2, E+4).
    lane = jax.lax.broadcasted_iota(jnp.int32, dual.shape, 1)
    logit_lanes = (lane >= embed_dim) & (lane < embed_dim + 2)
    lp_lanes = (lane >= embed_dim + 2) & (lane < embed_dim + 4)

    masked = jnp.where(logit_lanes, dual, jnp.float32(-1e30))
    m = jnp.max(masked, axis=-1, keepdims=True)
    s = jnp.sum(jnp.where(logit_lanes, jnp.exp(masked - m), 0.0),
                axis=-1, keepdims=True)
    lse = m + jnp.log(s)

    # Single lane-dense, unmasked 128-lane store:
    #   lanes [0:E)       -> embeds
    #   lanes [E:E+2)     -> logits
    #   lanes [E+2:E+4)   -> log_probs
    out_ref[...] = emb + jnp.where(lp_lanes, dual - lse, dual)


# ------------------------------ host wrapper -------------------------------- #

def comp_class_forward(x, w_slab, b_slab, embed_dim, tile_m=512):
    n, dim = x.shape
    x_bf16 = x.astype(jnp.bfloat16)

    # Batch tiling: TILE_M=512 (multiple of 256 for v6e/v7x MXU cadence) when the
    # batch is large; otherwise a single full-array block rounded up to 8 rows.
    if n >= tile_m:
        tm = tile_m
    else:
        tm = max(8, ((n + 7) // 8) * 8)
    n_pad = pl.cdiv(n, tm) * tm
    if n_pad != n:
        x_bf16 = jnp.pad(x_bf16, ((0, n_pad - n), (0, 0)))

    w_rows = w_slab.shape[0]
    cost = pl.CostEstimate(
        flops=2 * n_pad * w_rows * LANE,
        transcendentals=n_pad * (LANE + 1),
        bytes_accessed=(n_pad * dim * 2          # bf16 input
                        + n_pad * LANE * 4       # f32 packed output
                        + w_slab.size * 2 + b_slab.size * 4),
    )

    out = pl.pallas_call(
        functools.partial(comp_class_kernel, embed_dim),
        grid=(n_pad // tm,),
        in_specs=[
            pl.BlockSpec((tm, dim), lambda i: (i, 0)),
            pl.BlockSpec(w_slab.shape, lambda i: (0, 0)),   # resident across steps
            pl.BlockSpec(b_slab.shape, lambda i: (0, 0)),   # resident across steps
        ],
        out_specs=pl.BlockSpec((tm, LANE), lambda i: (i, 0)),
        out_shape=jax.ShapeDtypeStruct((n_pad, LANE), jnp.float32),
        compiler_params=pltpu.CompilerParams(
            dimension_semantics=("parallel",)),
        cost_estimate=cost,
    )(x_bf16, w_slab, b_slab)

    embeds = out[:n, 0:embed_dim]
    logits = out[:n, embed_dim:embed_dim + 2]
    log_probs = out[:n, embed_dim + 2:embed_dim + 4]
    return embeds, log_probs, logits


# --------------------- raw params + host-side folding ----------------------- #

def init_params(key, dim, comp_hidden, embed_dim, class_hidden):
    """Raw (unfolded) params; weights stored (in_features, out_features)."""
    keys = iter(jax.random.split(key, 40))

    def w(shape, scale=0.05):
        return scale * jax.random.normal(next(keys), shape, jnp.float32)

    def vec(n, scale=0.05):
        return scale * jax.random.normal(next(keys), (n,), jnp.float32)

    def bn(n):
        gamma = 1.0 + 0.1 * jax.random.normal(next(keys), (n,), jnp.float32)
        beta = 0.1 * jax.random.normal(next(keys), (n,), jnp.float32)
        mean = 0.1 * jax.random.normal(next(keys), (n,), jnp.float32)
        var = 1.0 + 0.1 * jnp.abs(jax.random.normal(next(keys), (n,), jnp.float32))
        return dict(g=gamma, b=beta, m=mean, v=var)

    H, E, C = comp_hidden, embed_dim, class_hidden
    return dict(
        bn0=bn(dim),
        w0=w((dim, H)), b0=vec(H), bn_h0=bn(H),        # MLP hidden 0
        w1=w((H, H)), b1=vec(H), bn_h1=bn(H),          # MLP hidden 1
        wm=w((H, H)), bm=vec(H),                       # MLP output linear
        we=w((H, E)), be=vec(E),                       # activate_out Linear
        wc0=w((E, C)), bc0=vec(C), bn_c0=bn(C),        # classifier hidden
        wco=w((C, 2)), bco=vec(2),                     # classifier output
    )


def _bn_scale_shift(q):
    s = q["g"] * jax.lax.rsqrt(q["v"] + BN_EPS)
    return s, q["b"] - q["m"] * s


def _pad2(w, rows, cols):
    return jnp.zeros((rows, cols), jnp.float32).at[:w.shape[0], :w.shape[1]].set(w)


def fold_and_pack(p, dim, embed_dim):
    """Fold eval-mode BNs into linears, pre-multiply the two back-to-back
    linears, zero-pad to 128 lanes, and pack into one bf16 weight slab and one
    f32 bias slab.  The classifier output columns are placed at lanes
    [E, E+2) and duplicated at [E+2, E+4) so the kernel can emit logits and
    log_probs in their final output lanes without any shift."""
    # initial BN folded into the input side of Linear0
    s_in, t_in = _bn_scale_shift(p["bn0"])
    w0 = s_in[:, None] * p["w0"]
    b0 = t_in @ p["w0"] + p["b0"]
    # post-Linear0 BN folded into columns/bias
    s, t = _bn_scale_shift(p["bn_h0"])
    w0 = w0 * s[None, :]
    b0 = b0 * s + t

    s, t = _bn_scale_shift(p["bn_h1"])
    w1 = p["w1"] * s[None, :]
    b1 = p["b1"] * s + t

    # MLP output linear @ activate_out linear (no nonlinearity between them)
    wme = p["wm"] @ p["we"]
    bme = p["bm"] @ p["we"] + p["be"]

    s, t = _bn_scale_shift(p["bn_c0"])
    wc0 = p["wc0"] * s[None, :]
    bc0 = p["bc0"] * s + t

    # classifier output: columns at lanes [E, E+2) and duplicated at [E+2, E+4)
    E = embed_dim
    wco_dual = jnp.zeros((LANE, LANE), jnp.float32)
    wco_dual = wco_dual.at[:p["wco"].shape[0], E:E + 2].set(p["wco"])
    wco_dual = wco_dual.at[:p["wco"].shape[0], E + 2:E + 4].set(p["wco"])

    w_slab = jnp.concatenate([
        _pad2(w0, dim, LANE),
        _pad2(w1, LANE, LANE),
        _pad2(wme, LANE, LANE),
        _pad2(wc0, LANE, LANE),
        wco_dual,
    ], axis=0).astype(jnp.bfloat16)

    b_slab = jnp.zeros((8, LANE), jnp.float32)
    for i, bias in enumerate([b0, b1, bme, bc0]):
        b_slab = b_slab.at[i, :bias.shape[0]].set(bias)
    b_slab = b_slab.at[4, E:E + 2].set(p["bco"])
    b_slab = b_slab.at[4, E + 2:E + 4].set(p["bco"])

    return w_slab, b_slab


# --------------------------- pure-JAX reference ----------------------------- #

def reference_forward(x, p):
    def bn(h, q):
        return (h - q["m"]) * jax.lax.rsqrt(q["v"] + BN_EPS) * q["g"] + q["b"]

    def leaky(h):
        return jnp.where(h >= 0, h, NEG_SLOPE * h)

    x = bn(x, p["bn0"])
    h = leaky(bn(x @ p["w0"] + p["b0"], p["bn_h0"]))
    h = leaky(bn(h @ p["w1"] + p["b1"], p["bn_h1"]))
    h = h @ p["wm"] + p["bm"]
    emb = h @ p["we"] + p["be"]
    c = leaky(bn(emb @ p["wc0"] + p["bc0"], p["bn_c0"]))
    logits = c @ p["wco"] + p["bco"]
    return emb, jax.nn.log_softmax(logits, axis=-1), logits


if __name__ == "__main__":
    # feat_root='ecapa' -> 256, context=0 -> dim=256, comp_hidden=64,
    # comp_layers=2, embed_dim=32, class_hidden=32, class_layers=1,
    # no_initial_bn=False, no 'seq' in feat_root -> rnn=None.
    DIM = 256
    COMP_HIDDEN = 64
    EMBED_DIM = 32
    CLASS_HIDDEN = 32
    BATCH = 8

    key = jax.random.PRNGKey(0)
    kx, kp, kx2 = jax.random.split(key, 3)
    x = jax.random.normal(kx, (BATCH, DIM), jnp.float32)

    raw = init_params(kp, DIM, COMP_HIDDEN, EMBED_DIM, CLASS_HIDDEN)
    w_slab, b_slab = fold_and_pack(raw, DIM, EMBED_DIM)

    # --- small batch (single-block path) ---
    embeds, log_probs, logits = comp_class_forward(x, w_slab, b_slab, EMBED_DIM)
    jax.block_until_ready((embeds, log_probs, logits))

    assert embeds.shape == (BATCH, EMBED_DIM)
    assert log_probs.shape == (BATCH, 2)
    assert logits.shape == (BATCH, 2)
    # log_softmax sanity: exp(log_probs) rows sum to 1
    assert bool(jnp.allclose(jnp.exp(log_probs).sum(-1), 1.0, atol=1e-5))

    r_emb, r_lp, r_logits = reference_forward(x, raw)
    assert bool(jnp.allclose(embeds, r_emb, atol=5e-2, rtol=5e-2))
    assert bool(jnp.allclose(logits, r_logits, atol=5e-2, rtol=5e-2))
    assert bool(jnp.allclose(log_probs, r_lp, atol=5e-2, rtol=5e-2))

    # --- larger batch: exercises the tiled grid + row padding path ---
    N2 = 1037   # not a multiple of TILE_M -> pads to 1536, grid=(3,)
    x2 = jax.random.normal(kx2, (N2, DIM), jnp.float32)
    e2, lp2, lg2 = comp_class_forward(x2, w_slab, b_slab, EMBED_DIM)
    jax.block_until_ready((e2, lp2, lg2))
    r_e2, r_lp2, r_lg2 = reference_forward(x2, raw)
    assert e2.shape == (N2, EMBED_DIM) and lg2.shape == (N2, 2) and lp2.shape == (N2, 2)
    assert bool(jnp.allclose(e2, r_e2, atol=5e-2, rtol=5e-2))
    assert bool(jnp.allclose(lg2, r_lg2, atol=5e-2, rtol=5e-2))
    assert bool(jnp.allclose(lp2, r_lp2, atol=5e-2, rtol=5e-2))

    print("KERNEL_OK")
</pallas_src>

<mosaic_0001>
module attributes {stable_mosaic.version = 11 : i64} {
  func.func @comp_class_kernel(%arg0: i32, %arg1: memref<8x256xbf16, #tpu.memory_space<vmem>>, %arg2: memref<768x128xbf16, #tpu.memory_space<vmem>>, %arg3: memref<8x128xf32, #tpu.memory_space<vmem>>, %arg4: memref<8x128xf32, #tpu.memory_space<vmem>>) attributes {dimension_semantics = [#tpu.dimension_semantics<parallel>], iteration_bounds = array<i64: 1>, scalar_prefetch = 0 : i64, scratch_operands = 0 : i64, tpu.core_type = #tpu.core_type<tc>, window_params = [{transform_indices = @transform_0, window_bounds = array<i64: 8, 256>}, {pipeline_mode = #tpu.pipeline_mode<synchronous>, transform_indices = @transform_1, window_bounds = array<i64: 768, 128>}, {pipeline_mode = #tpu.pipeline_mode<synchronous>, transform_indices = @transform_2, window_bounds = array<i64: 8, 128>}, {transform_indices = @transform_3, window_bounds = array<i64: 8, 128>}]} {
    %c0 = arith.constant 0 : index
    %c0_0 = arith.constant 0 : index
    %0 = vector.load %arg3[%c0, %c0_0] : memref<8x128xf32, #tpu.memory_space<vmem>>, vector<8x128xf32>
    %c0_1 = arith.constant 0 : index
    %c0_2 = arith.constant 0 : index
    %1 = vector.load %arg1[%c0_1, %c0_2] : memref<8x256xbf16, #tpu.memory_space<vmem>>, vector<8x256xbf16>
    %c0_3 = arith.constant 0 : index
    %c0_4 = arith.constant 0 : index
    %2 = vector.load %arg2[%c0_3, %c0_4] : memref<768x128xbf16, #tpu.memory_space<vmem>>, vector<256x128xbf16>
    %cst = arith.constant dense<0.000000e+00> : vector<8x128xf32>
    %3 = tpu.matmul %1, %2, %cst {dimension_numbers = #tpu.dot_dimension_numbers<[1], [0], [0], [1], [0, 0, 1, 1], [], []>} : vector<8x256xbf16>, vector<256x128xbf16>, vector<8x128xf32> -> vector<8x128xf32>
    %4 = vector.extract_strided_slice %0 {offsets = [0, 0], sizes = [1, 128], strides = [1, 1]} : vector<8x128xf32> to vector<1x128xf32>
    %5 = vector.broadcast %4 : vector<1x128xf32> to vector<8x128xf32>
    %6 = arith.addf %3, %5 : vector<8x128xf32>
    %cst_5 = arith.constant 0.00999999977 : f32
    %7 = vector.broadcast %cst_5 : f32 to vector<8x128xf32>
    %8 = arith.mulf %7, %6 : vector<8x128xf32>
    %9 = arith.maximumf %6, %8 : vector<8x128xf32>
    %10 = arith.truncf %9 : vector<8x128xf32> to vector<8x128xbf16>
    %c256 = arith.constant 256 : index
    %c0_6 = arith.constant 0 : index
    %11 = vector.load %arg2[%c256, %c0_6] : memref<768x128xbf16, #tpu.memory_space<vmem>>, vector<128x128xbf16>
    %cst_7 = arith.constant dense<0.000000e+00> : vector<8x128xf32>
    %12 = tpu.matmul %10, %11, %cst_7 {dimension_numbers = #tpu.dot_dimension_numbers<[1], [0], [0], [1], [0, 0, 1, 1], [], []>} : vector<8x128xbf16>, vector<128x128xbf16>, vector<8x128xf32> -> vector<8x128xf32>
    %13 = vector.extract_strided_slice %0 {offsets = [1, 0], sizes = [1, 128], strides = [1, 1]} : vector<8x128xf32> to vector<1x128xf32>
    %14 = vector.broadcast %13 : vector<1x128xf32> to vector<8x128xf32>
    %15 = arith.addf %12, %14 : vector<8x128xf32>
    %cst_8 = arith.constant 0.00999999977 : f32
    %16 = vector.broadcast %cst_8 : f32 to vector<8x128xf32>
    %17 = arith.mulf %16, %15 : vector<8x128xf32>
    %18 = arith.maximumf %15, %17 : vector<8x128xf32>
    %19 = arith.truncf %18 : vector<8x128xf32> to vector<8x128xbf16>
    %c384 = arith.constant 384 : index
    %c0_9 = arith.constant 0 : index
    %20 = vector.load %arg2[%c384, %c0_9] : memref<768x128xbf16, #tpu.memory_space<vmem>>, vector<128x128xbf16>
    %cst_10 = arith.constant dense<0.000000e+00> : vector<8x128xf32>
    %21 = tpu.matmul %19, %20, %cst_10 {dimension_numbers = #tpu.dot_dimension_numbers<[1], [0], [0], [1], [0, 0, 1, 1], [], []>} : vector<8x128xbf16>, vector<128x128xbf16>, vector<8x128xf32> -> vector<8x128xf32>
    %22 = vector.extract_strided_slice %0 {offsets = [2, 0], sizes = [1, 128], strides = [1, 1]} : vector<8x128xf32> to vector<1x128xf32>
    %23 = vector.broadcast %22 : vector<1x128xf32> to vector<8x128xf32>
    %24 = arith.addf %21, %23 : vector<8x128xf32>
    %25 = arith.truncf %24 : vector<8x128xf32> to vector<8x128xbf16>
    %c512 = arith.constant 512 : index
    %c0_11 = arith.constant 0 : index
    %26 = vector.load %arg2[%c512, %c0_11] : memref<768x128xbf16, #tpu.memory_space<vmem>>, vector<128x128xbf16>
    %cst_12 = arith.constant dense<0.000000e+00> : vector<8x128xf32>
    %27 = tpu.matmul %25, %26, %cst_12 {dimension_numbers = #tpu.dot_dimension_numbers<[1], [0], [0], [1], [0, 0, 1, 1], [], []>} : vector<8x128xbf16>, vector<128x128xbf16>, vector<8x128xf32> -> vector<8x128xf32>
    %28 = vector.extract_strided_slice %0 {offsets = [3, 0], sizes = [1, 128], strides = [1, 1]} : vector<8x128xf32> to vector<1x128xf32>
    %29 = vector.broadcast %28 : vector<1x128xf32> to vector<8x128xf32>
    %30 = arith.addf %27, %29 : vector<8x128xf32>
    %cst_13 = arith.constant 0.00999999977 : f32
    %31 = vector.broadcast %cst_13 : f32 to vector<8x128xf32>
    %32 = arith.mulf %31, %30 : vector<8x128xf32>
    %33 = arith.maximumf %30, %32 : vector<8x128xf32>
    %34 = arith.truncf %33 : vector<8x128xf32> to vector<8x128xbf16>
    %c640 = arith.constant 640 : index
    %c0_14 = arith.constant 0 : index
    %35 = vector.load %arg2[%c640, %c0_14] : memref<768x128xbf16, #tpu.memory_space<vmem>>, vector<128x128xbf16>
    %cst_15 = arith.constant dense<0.000000e+00> : vector<8x128xf32>
    %36 = tpu.matmul %34, %35, %cst_15 {dimension_numbers = #tpu.dot_dimension_numbers<[1], [0], [0], [1], [0, 0, 1, 1], [], []>} : vector<8x128xbf16>, vector<128x128xbf16>, vector<8x128xf32> -> vector<8x128xf32>
    %37 = vector.extract_strided_slice %0 {offsets = [4, 0], sizes = [1, 128], strides = [1, 1]} : vector<8x128xf32> to vector<1x128xf32>
    %38 = vector.broadcast %37 : vector<1x128xf32> to vector<8x128xf32>
    %39 = arith.addf %36, %38 : vector<8x128xf32>
    %40 = tpu.iota {dimensions = array<i32: 1>} : vector<8x128xi32>
    %c32_i32 = arith.constant 32 : i32
    %41 = vector.broadcast %c32_i32 : i32 to vector<8x128xi32>
    %42 = arith.cmpi sge, %40, %41 : vector<8x128xi32>
    %c34_i32 = arith.constant 34 : i32
    %43 = vector.broadcast %c34_i32 : i32 to vector<8x128xi32>
    %44 = arith.cmpi slt, %40, %43 : vector<8x128xi32>
    %45 = arith.andi %42, %44 : vector<8x128xi1>
    %c34_i32_16 = arith.constant 34 : i32
    %46 = vector.broadcast %c34_i32_16 : i32 to vector<8x128xi32>
    %47 = arith.cmpi sge, %40, %46 : vector<8x128xi32>
    %c36_i32 = arith.constant 36 : i32
    %48 = vector.broadcast %c36_i32 : i32 to vector<8x128xi32>
    %49 = arith.cmpi slt, %40, %48 : vector<8x128xi32>
    %50 = arith.andi %47, %49 : vector<8x128xi1>
    %cst_17 = arith.constant -1.000000e+30 : f32
    %51 = vector.broadcast %cst_17 : f32 to vector<8x128xf32>
    %52 = arith.select %45, %39, %51 : vector<8x128xi1>, vector<8x128xf32>
    %cst_18 = arith.constant dense<0xFF800000> : vector<8xf32>
    %53 = vector.multi_reduction <maximumf>, %52, %cst_18 [1] : vector<8x128xf32> to vector<8xf32>
    %54 = vector.shape_cast %53 : vector<8xf32> to vector<8x1xf32>
    %55 = vector.broadcast %54 : vector<8x1xf32> to vector<8x128xf32>
    %56 = arith.subf %52, %55 : vector<8x128xf32>
    %57 = math.exp %56 : vector<8x128xf32>
    %cst_19 = arith.constant 0.000000e+00 : f32
    %58 = vector.broadcast %cst_19 : f32 to vector<8x128xf32>
    %59 = arith.select %45, %57, %58 : vector<8x128xi1>, vector<8x128xf32>
    %cst_20 = arith.constant dense<0.000000e+00> : vector<8xf32>
    %60 = vector.multi_reduction <add>, %59, %cst_20 [1] : vector<8x128xf32> to vector<8xf32>
    %61 = vector.shape_cast %60 : vector<8xf32> to vector<8x1xf32>
    %62 = math.log %61 : vector<8x1xf32>
    %63 = arith.addf %54, %62 : vector<8x1xf32>
    %64 = vector.broadcast %63 : vector<8x1xf32> to vector<8x128xf32>
    %65 = arith.subf %39, %64 : vector<8x128xf32>
    %66 = arith.select %50, %65, %39 : vector<8x128xi1>, vector<8x128xf32>
    %67 = arith.addf %24, %66 : vector<8x128xf32>
    %c0_21 = arith.constant 0 : index
    %c0_22 = arith.constant 0 : index
    %68 = vector.load %arg4[%c0_21, %c0_22] : memref<8x128xf32, #tpu.memory_space<vmem>>, vector<8x128xf32>
    tpu.vector_store %arg4[%c0_21, %c0_22], %67 {strides = array<i32>} : memref<8x128xf32, #tpu.memory_space<vmem>>, vector<8x128xf32>,
    return
  }
  func.func @transform_0(%arg0: i32) -> (i32, i32) {
    %c0_i32 = arith.constant 0 : i32
    %c0_i32_0 = arith.constant 0 : i32
    return %arg0, %c0_i32 : i32, i32
  }
  func.func @transform_1(%arg0: i32) -> (i32, i32) {
    %c0_i32 = arith.constant 0 : i32
    %c0_i32_0 = arith.constant 0 : i32
    %c0_i32_1 = arith.constant 0 : i32
    return %c0_i32, %c0_i32_0 : i32, i32
  }
  func.func @transform_2(%arg0: i32) -> (i32, i32) {
    %c0_i32 = arith.constant 0 : i32
    %c0_i32_0 = arith.constant 0 : i32
    %c0_i32_1 = arith.constant 0 : i32
    return %c0_i32, %c0_i32_0 : i32, i32
  }
  func.func @transform_3(%arg0: i32) -> (i32, i32) {
    %c0_i32 = arith.constant 0 : i32
    %c0_i32_0 = arith.constant 0 : i32
    return %arg0, %c0_i32 : i32, i32
  }
}

</mosaic_0001>

<bundles_post_ra>
// kernel: tpu_custom_call.1
= control target key start
LH: loop header
LB: loop body
LE: loop exit
PB: predicated region body
PF: predicated region fallthrough
CT: control target
= control target key end

     0   :  { %8 = vsyncpa [#allocation3], 0  ;;  %s1148_s0 = inlined_call_operand.hbm [shape: bf16[8,256], index: 0, kind: input, shape index: {}]   ;;  %s1149_s1 = inlined_call_operand.hbm [shape: bf16[768,128], index: 1, kind: input, shape index: {}]   ;;  %s1150_s2 = inlined_call_operand.hbm [shape: f32[8,128], index: 2, kind: input, shape index: {}]   ;;  %s1151_s3 = inlined_call_operand.hbm [shape: f32[8,128], index: 3, kind: output, shape index: {}]  }
   0x1   :  { %9 = vsyncpa [#allocation6], 0 }
   0x2   :  { %10 = vsyncpa [#allocation4], 0  ;;  %s1052_s12 = smov [#allocation5]  }
   0x3   :  { %s26_s13 = sshll.u32 %s1052_s12, 4  ;;  %s27_s13 = int_to_ptr.vmem [resolvable:$true] %s26_s13 }
   0x4   :  { %s974_s14 = scalar_lea.vmem %s27_s13, 6144  ;;  %p979_p1 = scmp.lt.s32.totalorder %s27_s13, %s27_s13 }
   0x5   :  { %p975_p0 = scmp.ne.s32.totalorder %s27_s13, %s974_s14  ;;  %p980_p2 = scmp.lt.s32.totalorder %s974_s14, %s974_s14 }
   0x7   :  { %p981_p3 = por %p980_p2, %p979_p1 }
   0x9   :  { %p982_p4 = pnand %p981_p3, %p975_p0 }
   0xb   :  { %985 = shalt.err (!%p982_p4)
}
   0xc   :  { %s1053_s15 = smov 64   ;;  %s1054_s16 = smov 4  }
   0xd   :  { %32 = dma.hbm_to_vmem [thread:$0]  %s1149_s1, 6144, %s27_s13, [#allocation6], %s1053_s15, %s1053_s15, %s1054_s16  }
   0xe   :  { %s1055_s19 = smov [#allocation2]   ;;  %s1056_s21 = smov [#allocation7]  }
   0xf   :  { %s17_s20 = sshll.u32 %s1055_s19, 4  ;;  %s39_s22 = sshll.u32 %s1056_s21, 4  ;;  %s18_s20 = int_to_ptr.vmem [resolvable:$true] %s17_s20  ;;  %s40_s22 = int_to_ptr.vmem [resolvable:$true] %s39_s22 }
  0x10   :  { %s994_s23 = scalar_lea.vmem %s18_s20, 128  ;;  %p999_p6 = scmp.lt.s32.totalorder %s18_s20, %s18_s20 }
  0x11   :  { %p995_p5 = scmp.ne.s32.totalorder %s18_s20, %s994_s23  ;;  %p1000_p7 = scmp.lt.s32.totalorder %s994_s23, %s994_s23 }
  0x13   :  { %p1001_p8 = por %p1000_p7, %p999_p6 }
  0x15   :  { %p1002_p9 = pnand %p1001_p8, %p995_p5 }
  0x17   :  { %1005 = shalt.err (!%p1002_p9)
}
  0x18   :  { %20 = dma.hbm_to_vmem [thread:$0]  %s1148_s0, 128, %s18_s20, [#allocation3]  }
  0x19   :  { %s1014_s26 = scalar_lea.vmem %s40_s22, 128  ;;  %p1019_p11 = scmp.lt.s32.totalorder %s40_s22, %s40_s22 }
  0x1a   :  { %p1015_p10 = scmp.ne.s32.totalorder %s40_s22, %s1014_s26  ;;  %p1020_p12 = scmp.lt.s32.totalorder %s1014_s26, %s1014_s26 }
  0x1c   :  { %p1021_p13 = por %p1020_p12, %p1019_p11 }
  0x1e   :  { %p1022_p0 = pnand %p1021_p13, %p1015_p10 }
  0x20   :  { %1025 = shalt.err (!%p1022_p0)
}
  0x21   :  { %42 = dma.hbm_to_vmem [thread:$0]  %s1150_s2, 128, %s40_s22, [#allocation6]  }
  0x22   :  { %1046 = dma.done.wait [#allocation3], 128  }
  0x23   :  { %1047 = vsyncadd [#allocation3], 4294967168 }
  0x24   :  { %1048 = dma.done.wait [#allocation6], 6272  }
  0x25   :  { %1049 = vsyncadd [#allocation6], 4294961024  ;;  %v1057_v0 = vmov 0.0   ;;  %v912_v1 = vld [vmem:[#allocation5 + $0x78] sm:$0xff]   ;;  %v914_v3 = vld [vmem:[#allocation5 + $0x70] sm:$0xff]   ;;  %vm1058_vm0 = vmmov 0   ;;  %v87_v34 = vlaneseq }
  0x26   :  { %824 = vmatprep.subr.bf16.mxu1 %v1057_v0  ;;  %v913_v2 = vld [vmem:[#allocation5 + $0x38] sm:$0xff]   ;;  %766 = vmatprep.subr.bf16.mxu0 %v912_v1  ;;  %v915_v4 = vld [vmem:[#allocation5 + $0x30] sm:$0xff]   ;;  %v916_v5 = vld [vmem:[#allocation5 + $0x68] sm:$0xff]   ;;  %s1059_s0 = smov [#allocation8]  }
  0x27   :  { %767 = vmatpush3.bf16.msra.mxu0 %v913_v2  ;;  %v917_v6 = vld [vmem:[#allocation5 + $0x28] sm:$0xff]   ;;  %v918_v7 = vld [vmem:[#allocation5 + $0x60] sm:$0xff]   ;;  %v920_v9 = vld [vmem:[#allocation5 + $0x58] sm:$0xff]   ;;  %840 = vmatprep.mubr.msk.bf16.mxu1 %vm1058_vm0, %v1057_v0  ;;  %v1110_v35 = vshrl.u32 %v87_v34, 7  ;;  %s706_s2 = sshll.u32 %s1059_s0, 4  ;;  %s707_s2 = int_to_ptr.vmem [resolvable:$true] %s706_s2 }
  0x28   :  { %768 = vmatprep.subr.bf16.mxu0 %v914_v3  ;;  %v919_v8 = vld [vmem:[#allocation5 + $0x20] sm:$0xff]   ;;  %v921_v10 = vld [vmem:[#allocation5 + $0x18] sm:$0xff]   ;;  %v922_v11 = vld [vmem:[#allocation5 + $0x50] sm:$0xff]   ;;  %s1026_s28 = scalar_lea.vmem %s707_s2, 128  ;;  %p1031_p2 = scmp.lt.s32.totalorder %s707_s2, %s707_s2 }
  0x29   :  { %v54_v12 = vld [vmem:[#allocation2] sm:$0xff]  ;;  %v923_v15 = vld [vmem:[#allocation5 + $0x10] sm:$0xff]   ;;  %v924_v16 = vld [vmem:[#allocation5 + $0x48] sm:$0xff]   ;;  %v89_v36 = vsub.s32 0, %v1110_v35  ;;  %v255_v57 = vsub.s32 1, %v1110_v35  ;;  %p1027_p1 = scmp.ne.s32.totalorder %s707_s2, %s1026_s28  ;;  %p1032_p3 = scmp.lt.s32.totalorder %s1026_s28, %s1026_s28 }
  0x2a   :  { %v717_v13 = vcombine.high %v54_v12, %v54_v12  ;;  %v930_v14 = vld [vmem:[#allocation5 + $0xb8] sm:$0xff]   ;;  %v931_v17 = vld [vmem:[#allocation5 + $0xb0] sm:$0xff]   ;;  %v925_v18 = vld [vmem:[#allocation5 + $0x8] sm:$0xff]   ;;  %v716_v23 = vcombine.low %v54_v12, %v54_v12 }
  0x2b   :  { %769 = vmatpush3.bf16.msra.mxu0 %v915_v4  ;;  %825 = vmatpush3.bf16.msra.mxu1 %v930_v14  ;;  %v926_v19 = vld [vmem:[#allocation5 + $0x40] sm:$0xff]   ;;  %v932_v20 = vld [vmem:[#allocation5 + $0xa8] sm:$0xff]   ;;  %v934_v24 = vld [vmem:[#allocation5 + $0x98] sm:$0xff]   ;;  %p1033_p4 = por %p1032_p3, %p1031_p2 }
  0x2c   :  { %770 = vmatprep.subr.bf16.mxu0 %v916_v5  ;;  %226 = vmatprep.mubr.bf16.mxu0 %v717_v13  ;;  %v927_v21 = vld [vmem:[#allocation5] sm:$0xff]   ;;  %v935_v25 = vld [vmem:[#allocation5 + $0x90] sm:$0xff]   ;;  %v936_v26 = vld [vmem:[#allocation5 + $0x88] sm:$0xff]  }
  0x2d   :  { %826 = vmatprep.subr.bf16.mxu1 %v1057_v0  ;;  %v933_v22 = vld [vmem:[#allocation5 + $0xa0] sm:$0xff]   ;;  %v938_v28 = vld [vmem:[#allocation5 + $0xf8] sm:$0xff]   ;;  %v939_v29 = vld [vmem:[#allocation5 + $0xf0] sm:$0xff]   ;;  %p1034_p5 = pnand %p1033_p4, %p1027_p1 }
  0x2e   :  { %v937_v27 = vld [vmem:[#allocation5 + $0x80] sm:$0xff]   ;;  %v940_v30 = vld [vmem:[#allocation5 + $0xe8] sm:$0xff]   ;;  %v942_v32 = vld [vmem:[#allocation5 + $0xd8] sm:$0xff]  }
  0x2f   :  { %771 = vmatpush3.bf16.msra.mxu0 %v917_v6  ;;  %827 = vmatpush3.bf16.msra.mxu1 %v931_v17  ;;  %v941_v31 = vld [vmem:[#allocation5 + $0xe0] sm:$0xff]   ;;  %v943_v33 = vld [vmem:[#allocation5 + $0xd0] sm:$0xff]   ;;  %v944_v48 = vld [vmem:[#allocation5 + $0xc8] sm:$0xff]  }
  0x30   :  { %772 = vmatprep.subr.bf16.mxu0 %v918_v7  ;;  %828 = vmatprep.subr.bf16.mxu1 %v1057_v0  ;;  %v1113_v37 = vld [vmem:[#allocation7] sm:$0xff]  ;;  %v946_v50 = vld [vmem:[#allocation5 + $0x138] sm:$0xff]   ;;  %v947_v51 = vld [vmem:[#allocation5 + $0x130] sm:$0xff]  }
  0x31   :  { %v90_v39 = vrot.slane %v1113_v37, %v89_v36  ;;  %v945_v49 = vld [vmem:[#allocation5 + $0xc0] sm:$0xff]   ;;  %v948_v52 = vld [vmem:[#allocation5 + $0x128] sm:$0xff]   ;;  %v950_v54 = vld [vmem:[#allocation5 + $0x118] sm:$0xff]   ;;  %v256_v58 = vrot.slane %v1113_v37, %v255_v57 }
  0x32   :  { %v949_v53 = vld [vmem:[#allocation5 + $0x120] sm:$0xff]   ;;  %v951_v55 = vld [vmem:[#allocation5 + $0x110] sm:$0xff]   ;;  %v952_v56 = vld [vmem:[#allocation5 + $0x108] sm:$0xff]  }
  0x33   :  { %773 = vmatpush3.bf16.msra.mxu0 %v919_v8  ;;  %829 = vmatpush3.bf16.msra.mxu1 %v932_v20  ;;  %v953_v4 = vld [vmem:[#allocation5 + $0x100] sm:$0xff]   ;;  %v954_v5 = vld [vmem:[#allocation5 + $0x178] sm:$0xff]   ;;  %v955_v6 = vld [vmem:[#allocation5 + $0x170] sm:$0xff]  }
  0x34   :  { %774 = vmatprep.subr.bf16.mxu0 %v920_v9  ;;  %830 = vmatprep.subr.bf16.mxu1 %v1057_v0  ;;  %v956_v7 = vld [vmem:[#allocation5 + $0x168] sm:$0xff]   ;;  %v957_v8 = vld [vmem:[#allocation5 + $0x160] sm:$0xff]   ;;  %v958_v9 = vld [vmem:[#allocation5 + $0x158] sm:$0xff]  }
  0x35   :  { %v961_v20 = vld [vmem:[#allocation5 + $0x140] sm:$0xff]  }
  0x37   :  { %775 = vmatpush3.bf16.msra.mxu0 %v921_v10  ;;  %831 = vmatpush3.bf16.msra.mxu1 %v933_v22  ;;  %v959_v10 = vld [vmem:[#allocation5 + $0x150] sm:$0xff]  }
  0x38   :  { %776 = vmatprep.subr.bf16.mxu0 %v922_v11  ;;  %832 = vmatprep.subr.bf16.mxu1 %v1057_v0  ;;  %v366_v11 = vsub.s32 2, %v1110_v35 }
  0x3a   :  { %v367_v12 = vrot.slane %v1113_v37, %v366_v11 }
  0x3b   :  { %777 = vmatpush3.bf16.msra.mxu0 %v923_v15  ;;  %833 = vmatpush3.bf16.msra.mxu1 %v934_v24 }
  0x3c   :  { %778 = vmatprep.subr.bf16.mxu0 %v924_v16  ;;  %834 = vmatprep.subr.bf16.mxu1 %v1057_v0 }
  0x3f   :  { %779 = vmatpush3.bf16.msra.mxu0 %v925_v18  ;;  %835 = vmatpush3.bf16.msra.mxu1 %v935_v25 }
  0x40   :  { %780 = vmatprep.subr.bf16.mxu0 %v926_v19  ;;  %836 = vmatprep.subr.bf16.mxu1 %v1057_v0  ;;  %v960_v19 = vld [vmem:[#allocation5 + $0x148] sm:$0xff]  }
  0x43   :  { %781 = vmatpush3.bf16.msra.mxu0 %v927_v21  ;;  %837 = vmatpush3.bf16.msra.mxu1 %v936_v26  ;;  %v475_v21 = vsub.s32 3, %v1110_v35 }
  0x44   :  { %844 = vmatprep.subr.bf16.mxu0 %v1057_v0  ;;  %838 = vmatprep.subr.bf16.mxu1 %v1057_v0 }
  0x45   :  { %v476_v22 = vrot.slane %v1113_v37, %v475_v21 }
  0x46   :  { %227 = vmatmul.mubr.bf16.vlgmr.msra.gmra.mxu0 %v716_v23 }
  0x47   :  { %860 = vmatprep.mubr.msk.bf16.mxu0 %vm1058_vm0, %v1057_v0  ;;  %839 = vmatpush3.bf16.msra.mxu1 %v937_v27 }
  0x48   :  { %864 = vmatprep.subr.bf16.mxu1 %v1057_v0  ;;  %845 = vmatpush3.bf16.msra.mxu0 %v938_v28 }
  0x49   :  { %846 = vmatprep.subr.bf16.mxu0 %v1057_v0 }
  0x4c   :  { %847 = vmatpush3.bf16.msra.mxu0 %v939_v29 }
  0x4d   :  { %848 = vmatprep.subr.bf16.mxu0 %v1057_v0 }
  0x50   :  { %849 = vmatpush3.bf16.msra.mxu0 %v940_v30 }
  0x51   :  { %850 = vmatprep.subr.bf16.mxu0 %v1057_v0 }
  0x54   :  { %851 = vmatpush3.bf16.msra.mxu0 %v941_v31  ;;  %v586_v31 = vsub.s32 4, %v1110_v35 }
  0x55   :  { %852 = vmatprep.subr.bf16.mxu0 %v1057_v0 }
  0x58   :  { %853 = vmatpush3.bf16.msra.mxu0 %v942_v32  ;;  %v677_v32 = vand.u32 127, %v87_v34 }
  0x59   :  { %854 = vmatprep.subr.bf16.mxu0 %v1057_v0 }
  0x5a   :  { %vm678_vm1 = vcmp.ge.s32.totalorder %v677_v32, 32  ;;  %vm679_vm2 = vcmp.lt.s32.totalorder %v677_v32, 34  ;;  %vm681_vm4 = vcmp.ge.s32.totalorder %v677_v32, 34  ;;  %vm682_vm5 = vcmp.lt.s32.totalorder %v677_v32, 36 }
  0x5b   :  { %vm680_vm3 = vmand %vm678_vm1, %vm679_vm2 }
  0x5c   :  { %855 = vmatpush3.bf16.msra.mxu0 %v943_v33  ;;  %vm683_vm6 = vmand %vm681_vm4, %vm682_vm5 }
  0x5d   :  { %856 = vmatprep.subr.bf16.mxu0 %v1057_v0 }
  0x60   :  { %857 = vmatpush3.bf16.msra.mxu0 %v944_v48 }
  0x61   :  { %858 = vmatprep.subr.bf16.mxu0 %v1057_v0 }
  0x64   :  { %859 = vmatpush3.bf16.msra.mxu0 %v945_v49 }
  0x65   :  { %884 = vmatprep.subr.bf16.mxu0 %v1057_v0 }
 0x106   :  { %v782_v38 = vpop.f32.mrf.mxu0 }
 0x108   :  { %v783_v40 = vpop.f32.mrf.mxu0 }
 0x109   :  { %v784_v41 = vadd.f32 %v783_v40, %v782_v38 }
 0x10a   :  { %v785_v42 = vpop.f32.mrf.mxu0 }
 0x10b   :  { %v229_v43 = vadd.f32 %v784_v41, %v90_v39 }
 0x10c   :  { %v786_v44 = vpop.f32.mrf.mxu0 }
 0x10d   :  { %v234_v45 = vmul.f32 0.01, %v229_v43 }
 0x10f   :  { %v235_v46 = vmax.f32 %v229_v43, %v234_v45 }
 0x111   :  { %v236_v47 = vpack.c.bf16 %v235_v46, %v235_v46 }
 0x113   :  { %841 = vmatmul.mubr.bf16.vlgmr.msra.gmra.mxu1 %v236_v47 }
 0x114   :  { %880 = vmatprep.mubr.msk.bf16.mxu1 %vm1058_vm0, %v1057_v0  ;;  %865 = vmatpush3.bf16.msra.mxu1 %v946_v50 }
 0x115   :  { %866 = vmatprep.subr.bf16.mxu1 %v1057_v0 }
 0x118   :  { %867 = vmatpush3.bf16.msra.mxu1 %v947_v51 }
 0x119   :  { %868 = vmatprep.subr.bf16.mxu1 %v1057_v0 }
 0x11c   :  { %869 = vmatpush3.bf16.msra.mxu1 %v948_v52 }
 0x11d   :  { %870 = vmatprep.subr.bf16.mxu1 %v1057_v0 }
 0x120   :  { %871 = vmatpush3.bf16.msra.mxu1 %v949_v53 }
 0x121   :  { %872 = vmatprep.subr.bf16.mxu1 %v1057_v0 }
 0x124   :  { %873 = vmatpush3.bf16.msra.mxu1 %v950_v54 }
 0x125   :  { %874 = vmatprep.subr.bf16.mxu1 %v1057_v0 }
 0x128   :  { %875 = vmatpush3.bf16.msra.mxu1 %v951_v55 }
 0x129   :  { %876 = vmatprep.subr.bf16.mxu1 %v1057_v0 }
 0x12c   :  { %877 = vmatpush3.bf16.msra.mxu1 %v952_v56 }
 0x12d   :  { %878 = vmatprep.subr.bf16.mxu1 %v1057_v0 }
 0x130   :  { %879 = vmatpush3.bf16.msra.mxu1 %v953_v4 }
 0x1d3   :  { %v339_v59 = vpop.f32.mrf.mxu1 }
 0x1d4   :  { %v340_v60 = vadd.f32 %v339_v59, %v256_v58 }
 0x1d5   :  { %v842_v61 = vpop.f32.mrf.mxu1 }
 0x1d6   :  { %v345_v62 = vmul.f32 0.01, %v340_v60 }
 0x1d7   :  { %v342_v63 = vpop.f32.mrf.mxu1 }
 0x1d8   :  { %v346_v1 = vmax.f32 %v340_v60, %v345_v62 }
 0x1d9   :  { %v843_v2 = vpop.f32.mrf.mxu1 }
 0x1da   :  { %v347_v3 = vpack.c.bf16 %v346_v1, %v346_v1 }
 0x1dc   :  { %861 = vmatmul.mubr.bf16.vlgmr.msra.gmra.mxu0 %v347_v3 }
 0x1dd   :  { %900 = vmatprep.mubr.msk.bf16.mxu0 %vm1058_vm0, %v1057_v0  ;;  %885 = vmatpush3.bf16.msra.mxu0 %v954_v5 }
 0x1de   :  { %886 = vmatprep.subr.bf16.mxu0 %v1057_v0 }
 0x1e1   :  { %887 = vmatpush3.bf16.msra.mxu0 %v955_v6 }
 0x1e2   :  { %888 = vmatprep.subr.bf16.mxu0 %v1057_v0 }
 0x1e5   :  { %889 = vmatpush3.bf16.msra.mxu0 %v956_v7 }
 0x1e6   :  { %890 = vmatprep.subr.bf16.mxu0 %v1057_v0 }
 0x1e9   :  { %891 = vmatpush3.bf16.msra.mxu0 %v957_v8 }
 0x1ea   :  { %892 = vmatprep.subr.bf16.mxu0 %v1057_v0 }
 0x1ed   :  { %893 = vmatpush3.bf16.msra.mxu0 %v958_v9 }
 0x1ee   :  { %894 = vmatprep.subr.bf16.mxu0 %v1057_v0 }
 0x1f1   :  { %895 = vmatpush3.bf16.msra.mxu0 %v959_v10 }
 0x1f2   :  { %896 = vmatprep.subr.bf16.mxu0 %v1057_v0 }
 0x1f5   :  { %897 = vmatpush3.bf16.msra.mxu0 %v960_v19 }
 0x1f6   :  { %898 = vmatprep.subr.bf16.mxu0 %v1057_v0  ;;  %v587_v0 = vrot.slane %v1113_v37, %v586_v31 }
 0x1f9   :  { %899 = vmatpush3.bf16.msra.mxu0 %v961_v20 }
 0x29c   :  { %v450_v13 = vpop.f32.mrf.mxu0 }
 0x29d   :  { %v451_v14 = vadd.f32 %v450_v13, %v367_v12 }
 0x29e   :  { %v862_v15 = vpop.f32.mrf.mxu0 }
 0x29f   :  { %v456_v16 = vpack.c.bf16 %v451_v14, %v451_v14 }
 0x2a0   :  { %v453_v17 = vpop.f32.mrf.mxu0 }
 0x2a1   :  { %881 = vmatmul.mubr.bf16.vlgmr.msra.gmra.mxu1 %v456_v16 }
 0x2a2   :  { %v863_v18 = vpop.f32.mrf.mxu0 }
 0x361   :  { %v559_v23 = vpop.f32.mrf.mxu1 }
 0x362   :  { %v560_v24 = vadd.f32 %v559_v23, %v476_v22 }
 0x363   :  { %v882_v25 = vpop.f32.mrf.mxu1 }
 0x364   :  { %v565_v26 = vmul.f32 0.01, %v560_v24 }
 0x365   :  { %v562_v27 = vpop.f32.mrf.mxu1 }
 0x366   :  { %v566_v28 = vmax.f32 %v560_v24, %v565_v26 }
 0x367   :  { %v883_v29 = vpop.f32.mrf.mxu1 }
 0x368   :  { %v567_v30 = vpack.c.bf16 %v566_v28, %v566_v28 }
 0x36a   :  { %901 = vmatmul.mubr.bf16.vlgmr.msra.gmra.mxu0 %v567_v30 }
 0x42a   :  { %v670_v33 = vpop.f32.mrf.mxu0 }
 0x42b   :  { %v671_v36 = vadd.f32 %v670_v33, %v587_v0 }
 0x42c   :  { %v902_v38 = vpop.f32.mrf.mxu0 }
 0x42d   :  { %v684_v39 = vsel %vm680_vm3, %v671_v36, -1e+30 }
 0x42e   :  { %685 = vmax.xlane.f32.xlu0 %v684_v39  ;;  %v673_v40 = vpop.f32.mrf.mxu0 }
 0x430   :  { %v903_v41 = vpop.f32.mrf.mxu0 }
 0x4b7   :  { %v686_v42 = vpop.xlane.xlu0 %685 }
 0x4b8   :  { %v687_v43 = vsub.f32 %v684_v39, %v686_v42 }
 0x4ba   :  { %v688_v44 = vmul.f32 1.442695, %v687_v43 }
 0x4bc   :  { %962 = vpow2.f32 %v688_v44 }
 0x4c9   :  { %v963_v45 = vpop.eup %962 }
 0x4ca   :  { %v690_v35 = vsel %vm680_vm3, %v963_v45, 0.0 }
 0x4cb   :  { %691 = vadd.xlane.f32.xlu0 %v690_v35 }
 0x554   :  { %v692_v34 = vpop.xlane.xlu0 %691 }
 0x555   :  { %964 = vlog2.f32 %v692_v34 }
 0x562   :  { %v965_v37 = vpop.eup %964 }
 0x563   :  { %v694_v46 = vmul.f32 0.6931472, %v965_v37 }
 0x565   :  { %v695_v47 = vadd.f32 %v694_v46, %v686_v42 }
 0x567   :  { %v696_v48 = vsub.f32 %v671_v36, %v695_v47 }
 0x569   :  { %v697_v49 = vsel %vm683_vm6, %v696_v48, %v671_v36 }
 0x56a   :  { %v698_v50 = vadd.f32 %v697_v49, %v451_v14 }
 0x56c   :  { %699 = vst [vmem:[#allocation8] sm:$0xff] %v698_v50 }
 0x56d   :  { %1037 = shalt.err (!%p1034_p5)
}
 0x56e   :  { %709 = dma.vmem_to_hbm [thread:$0]  %s707_s2, 128, %s1151_s3, [#allocation4]  }
 0x56f   :  { %1050 = dma.done.wait [#allocation4], 128  }
 0x570   :  { %1051 = vsyncadd [#allocation4], 4294967168 }
 0x571   :  { %713 = vsyncpa [#allocation3], 1 }
 0x572   :  { %714 = vsyncpa [#allocation6], 1 }
 0x573   :  { %715 = vsyncpa [#allocation4], 1 }

</bundles_post_ra>
